<compile_context>
chip_gen: v5e
topology: v5e:2x2
jax: 0.10.0
libtpu: 0.0.40
codegen_flags: <defaults>
</compile_context>

<pallas_src>
import functools

import jax
import jax.numpy as jnp
from jax.experimental import pallas as pl
from jax.experimental.pallas import tpu as pltpu


_LANE = 128
# Conservative live-VMEM budget per batch lane (f32 everywhere):
#   x   double-buffered: 2 * 8 sublanes * 4 B = 64 B   (3 rows pad to 8)
#   out double-buffered: 2 * 8 sublanes * 4 B = 64 B   (1 row pads to 8)
#   h1 (16 rows f32)                          = 64 B
#   h2 (8 rows f32)                           = 32 B
#   z / sigmoid temporaries, slack            ~ 96 B
_BYTES_PER_LANE = 320


def _round_up(n, m):
    return ((n + m - 1) // m) * m


def _mlp_kernel(x_ref, w1_ref, b1_ref, w2_ref, b2_ref, w3_ref, b3_ref, o_ref):
    """Linear -> ReLU -> Linear -> ReLU -> Linear -> Sigmoid, batch on lanes."""
    x = x_ref[...]                                                       # (3, TB)
    h1 = jnp.dot(w1_ref[...], x, preferred_element_type=jnp.float32) + b1_ref[...]
    h1 = jnp.maximum(h1, 0.0)                                            # (16, TB)
    # NOTE: on v7x, casting h1/h2 to bf16 here would shrink live VMEM/lane and
    # allow a ~1.4x larger tile; kept f32 to match PyTorch numerics exactly.
    h2 = jnp.dot(w2_ref[...], h1, preferred_element_type=jnp.float32) + b2_ref[...]
    h2 = jnp.maximum(h2, 0.0)                                            # (8, TB)
    z = jnp.dot(w3_ref[...], h2, preferred_element_type=jnp.float32) + b3_ref[...]
    # Exact, overflow-free sigmoid (single EUP tanh, no approx reciprocal).
    o_ref[...] = 0.5 * jnp.tanh(0.5 * z) + 0.5                           # (1, TB)


def _physical_vmem_bytes():
    """Physical VMEM of the current chip; falls back to a v7x-safe 64 MiB."""
    try:
        info = pltpu.get_tpu_info()
        v = getattr(info, "vmem_capacity_bytes", None)
        if v:
            return int(v)
    except Exception:
        pass
    return 64 << 20


def _pick_tile(b_pad, phys_vmem):
    """Pick the batch tile TB (lanes, multiple of 128)."""
    # Use ~45% of physical VMEM for the working set: ~28 MiB on v7x (64 MiB),
    # ~57 MiB on v5e/v6e (128 MiB).  Each grid step then moves multiple MiB of
    # HBM traffic, amortizing the ~0.35 us fixed per-step pipeline overhead.
    budget = int(phys_vmem * 0.45)
    max_lanes = max(_LANE, (budget // _BYTES_PER_LANE) // _LANE * _LANE)
    # Keep the grid at >= 2 steps whenever the batch allows it, so the
    # "parallel" axis can shard across v7x's two TensorCores.
    half = _round_up(pl.cdiv(b_pad, 2), _LANE)
    return max(_LANE, min(max_lanes, half))


def rain_prediction_forward_fm(xt, params, *, tile_b=None):
    """Feature-major forward. xt: (3, B) float32. Returns (1, B) float32."""
    B = xt.shape[1]
    # Pad only to lane granularity (decoupled from TB: waste < 128 lanes).
    b_pad = _round_up(B, _LANE)
    if b_pad != B:
        xt = jnp.pad(xt, ((0, 0), (0, b_pad - B)))

    phys_vmem = _physical_vmem_bytes()
    TB = int(tile_b) if tile_b is not None else _pick_tile(b_pad, phys_vmem)
    TB = max(_LANE, _round_up(TB, _LANE))
    grid = (pl.cdiv(b_pad, TB),)            # ragged last block -> masked stores

    vmem_limit = int(min(int(phys_vmem * 0.9),
                         max(32 << 20, TB * _BYTES_PER_LANE + (4 << 20))))

    out_t = pl.pallas_call(
        _mlp_kernel,
        out_shape=jax.ShapeDtypeStruct((1, b_pad), jnp.float32),
        grid=grid,
        in_specs=[
            pl.BlockSpec((3, TB), lambda i: (0, i)),      # x tile: pipelined
            pl.BlockSpec((16, 3), lambda i: (0, 0)),      # weights/biases: resident
            pl.BlockSpec((16, 1), lambda i: (0, 0)),
            pl.BlockSpec((8, 16), lambda i: (0, 0)),
            pl.BlockSpec((8, 1), lambda i: (0, 0)),
            pl.BlockSpec((1, 8), lambda i: (0, 0)),
            pl.BlockSpec((1, 1), lambda i: (0, 0)),
        ],
        out_specs=pl.BlockSpec((1, TB), lambda i: (0, i)),  # lane-dense output
        compiler_params=pltpu.CompilerParams(
            dimension_semantics=("parallel",),
            vmem_limit_bytes=vmem_limit),
    )(
        xt,
        params["w1"], params["b1"],
        params["w2"], params["b2"],
        params["w3"], params["b3"],
    )
    return out_t[:, :B]


@functools.partial(jax.jit, static_argnames=("tile_b",))
def rain_prediction_forward(x, params, *, tile_b=None):
    """PyTorch-layout forward. x: (B, 3) float32. Returns (B, 1) float32.

    jitted so the transpose + pad + slice around the kernel fuse into a single
    XLA copy pass; prefer `rain_prediction_forward_fm` upstream to avoid even
    that (the kernel itself only needs feature-major (3, B))."""
    B = x.shape[0]
    xt = jnp.asarray(x, jnp.float32).T
    out_t = rain_prediction_forward_fm(xt, params, tile_b=tile_b)
    return out_t.reshape(B, 1)


def init_params(key):
    """PyTorch nn.Linear-style init: U[-1/sqrt(fan_in), +1/sqrt(fan_in)].
    Weights stored (out, in) exactly like PyTorch; biases stored (out, 1)."""
    dims = [(3, 16), (16, 8), (8, 1)]
    params = {}
    for i, (fan_in, fan_out) in enumerate(dims, start=1):
        key, kw, kb = jax.random.split(key, 3)
        bound = 1.0 / jnp.sqrt(float(fan_in))
        params[f"w{i}"] = jax.random.uniform(
            kw, (fan_out, fan_in), jnp.float32, minval=-bound, maxval=bound)
        params[f"b{i}"] = jax.random.uniform(
            kb, (fan_out, 1), jnp.float32, minval=-bound, maxval=bound)
    return params


def _reference(x, params):
    # Plain-JAX reference of the PyTorch forward (exact sigmoid).
    h1 = jnp.maximum(x @ params["w1"].T + params["b1"].T, 0.0)
    h2 = jnp.maximum(h1 @ params["w2"].T + params["b2"].T, 0.0)
    return jax.nn.sigmoid(h2 @ params["w3"].T + params["b3"].T)


if __name__ == "__main__":
    key = jax.random.PRNGKey(0)
    kp, kx1, kx2 = jax.random.split(key, 3)
    params = init_params(kp)

    # Small batch: single 128-lane tile, grid = 1.
    x1 = jax.random.normal(kx1, (8, 3), dtype=jnp.float32)
    out1 = jax.block_until_ready(rain_prediction_forward(x1, params))
    ref1 = _reference(x1, params)
    assert out1.shape == (8, 1)
    assert jnp.allclose(out1, ref1, atol=2e-3), "mismatch vs reference (small batch)"

    # Non-multiple-of-128 batch with auto tiling: B_pad=384, TB=256 -> grid of
    # 2 with a ragged (masked) final block, exercising the decoupled padding.
    x2 = jax.random.normal(kx2, (300, 3), dtype=jnp.float32)
    out2 = jax.block_until_ready(rain_prediction_forward(x2, params))
    ref2 = _reference(x2, params)
    assert out2.shape == (300, 1)
    assert jnp.allclose(out2, ref2, atol=2e-3), "mismatch vs reference (auto tile)"

    # Forced small tile: multi-step grid with exact division (TB=128, grid=3).
    out3 = jax.block_until_ready(rain_prediction_forward(x2, params, tile_b=128))
    assert jnp.allclose(out3, ref2, atol=2e-3), "mismatch vs reference (forced tile)"

    print("KERNEL_OK")
</pallas_src>

<mosaic_0001>
module attributes {stable_mosaic.version = 11 : i64} {
  func.func @_mlp_kernel(%arg0: i32, %arg1: memref<3x128xf32, #tpu.memory_space<vmem>>, %arg2: memref<16x3xf32, #tpu.memory_space<vmem>>, %arg3: memref<16x1xf32, #tpu.memory_space<vmem>>, %arg4: memref<8x16xf32, #tpu.memory_space<vmem>>, %arg5: memref<8x1xf32, #tpu.memory_space<vmem>>, %arg6: memref<1x8xf32, #tpu.memory_space<vmem>>, %arg7: memref<1x1xf32, #tpu.memory_space<vmem>>, %arg8: memref<1x128xf32, #tpu.memory_space<vmem>>) attributes {dimension_semantics = [#tpu.dimension_semantics<parallel>], iteration_bounds = array<i64: 1>, scalar_prefetch = 0 : i64, scratch_operands = 0 : i64, tpu.core_type = #tpu.core_type<tc>, window_params = [{transform_indices = @transform_0, window_bounds = array<i64: 3, 128>}, {pipeline_mode = #tpu.pipeline_mode<synchronous>, transform_indices = @transform_1, window_bounds = array<i64: 16, 3>}, {pipeline_mode = #tpu.pipeline_mode<synchronous>, transform_indices = @transform_2, window_bounds = array<i64: 16, 1>}, {pipeline_mode = #tpu.pipeline_mode<synchronous>, transform_indices = @transform_3, window_bounds = array<i64: 8, 16>}, {pipeline_mode = #tpu.pipeline_mode<synchronous>, transform_indices = @transform_4, window_bounds = array<i64: 8, 1>}, {pipeline_mode = #tpu.pipeline_mode<synchronous>, transform_indices = @transform_5, window_bounds = array<i64: 1, 8>}, {pipeline_mode = #tpu.pipeline_mode<synchronous>, transform_indices = @transform_6, window_bounds = array<i64: 1, 1>}, {transform_indices = @transform_7, window_bounds = array<i64: 1, 128>}]} {
    %c0 = arith.constant 0 : index
    %c0_0 = arith.constant 0 : index
    %0 = vector.load %arg1[%c0, %c0_0] : memref<3x128xf32, #tpu.memory_space<vmem>>, vector<3x128xf32>
    %c0_1 = arith.constant 0 : index
    %c0_2 = arith.constant 0 : index
    %1 = vector.load %arg2[%c0_1, %c0_2] : memref<16x3xf32, #tpu.memory_space<vmem>>, vector<16x3xf32>
    %cst = arith.constant dense<0.000000e+00> : vector<16x128xf32>
    %2 = tpu.matmul %1, %0, %cst {dimension_numbers = #tpu.dot_dimension_numbers<[1], [0], [0], [1], [0, 0, 1, 1], [], []>} : vector<16x3xf32>, vector<3x128xf32>, vector<16x128xf32> -> vector<16x128xf32>
    %c0_3 = arith.constant 0 : index
    %c0_4 = arith.constant 0 : index
    %3 = vector.load %arg3[%c0_3, %c0_4] : memref<16x1xf32, #tpu.memory_space<vmem>>, vector<16x1xf32>
    %4 = vector.broadcast %3 : vector<16x1xf32> to vector<16x128xf32>
    %5 = arith.addf %2, %4 : vector<16x128xf32>
    %cst_5 = arith.constant 0.000000e+00 : f32
    %6 = vector.broadcast %cst_5 : f32 to vector<16x128xf32>
    %7 = arith.maximumf %5, %6 : vector<16x128xf32>
    %c0_6 = arith.constant 0 : index
    %c0_7 = arith.constant 0 : index
    %8 = vector.load %arg4[%c0_6, %c0_7] : memref<8x16xf32, #tpu.memory_space<vmem>>, vector<8x16xf32>
    %cst_8 = arith.constant dense<0.000000e+00> : vector<8x128xf32>
    %9 = tpu.matmul %8, %7, %cst_8 {dimension_numbers = #tpu.dot_dimension_numbers<[1], [0], [0], [1], [0, 0, 1, 1], [], []>} : vector<8x16xf32>, vector<16x128xf32>, vector<8x128xf32> -> vector<8x128xf32>
    %c0_9 = arith.constant 0 : index
    %c0_10 = arith.constant 0 : index
    %10 = vector.load %arg5[%c0_9, %c0_10] : memref<8x1xf32, #tpu.memory_space<vmem>>, vector<8x1xf32>
    %11 = vector.broadcast %10 : vector<8x1xf32> to vector<8x128xf32>
    %12 = arith.addf %9, %11 : vector<8x128xf32>
    %cst_11 = arith.constant 0.000000e+00 : f32
    %13 = vector.broadcast %cst_11 : f32 to vector<8x128xf32>
    %14 = arith.maximumf %12, %13 : vector<8x128xf32>
    %c0_12 = arith.constant 0 : index
    %c0_13 = arith.constant 0 : index
    %15 = vector.load %arg6[%c0_12, %c0_13] : memref<1x8xf32, #tpu.memory_space<vmem>>, vector<1x8xf32>
    %cst_14 = arith.constant dense<0.000000e+00> : vector<1x128xf32>
    %16 = tpu.matmul %15, %14, %cst_14 {dimension_numbers = #tpu.dot_dimension_numbers<[1], [0], [0], [1], [0, 0, 1, 1], [], []>} : vector<1x8xf32>, vector<8x128xf32>, vector<1x128xf32> -> vector<1x128xf32>
    %c0_15 = arith.constant 0 : index
    %c0_16 = arith.constant 0 : index
    %17 = vector.load %arg7[%c0_15, %c0_16] : memref<1x1xf32, #tpu.memory_space<vmem>>, vector<1x1xf32>
    %18 = vector.broadcast %17 : vector<1x1xf32> to vector<1x128xf32>
    %19 = arith.addf %16, %18 : vector<1x128xf32>
    %cst_17 = arith.constant 5.000000e-01 : f32
    %20 = vector.broadcast %cst_17 : f32 to vector<1x128xf32>
    %21 = arith.mulf %20, %19 : vector<1x128xf32>
    %22 = math.tanh %21 : vector<1x128xf32>
    %cst_18 = arith.constant 5.000000e-01 : f32
    %23 = vector.broadcast %cst_18 : f32 to vector<1x128xf32>
    %24 = arith.mulf %23, %22 : vector<1x128xf32>
    %cst_19 = arith.constant 5.000000e-01 : f32
    %25 = vector.broadcast %cst_19 : f32 to vector<1x128xf32>
    %26 = arith.addf %24, %25 : vector<1x128xf32>
    %c0_20 = arith.constant 0 : index
    %c0_21 = arith.constant 0 : index
    %27 = vector.load %arg8[%c0_20, %c0_21] : memref<1x128xf32, #tpu.memory_space<vmem>>, vector<1x128xf32>
    tpu.vector_store %arg8[%c0_20, %c0_21], %26 {strides = array<i32>} : memref<1x128xf32, #tpu.memory_space<vmem>>, vector<1x128xf32>,
    return
  }
  func.func @transform_0(%arg0: i32) -> (i32, i32) {
    %c0_i32 = arith.constant 0 : i32
    %c0_i32_0 = arith.constant 0 : i32
    return %c0_i32, %arg0 : i32, i32
  }
  func.func @transform_1(%arg0: i32) -> (i32, i32) {
    %c0_i32 = arith.constant 0 : i32
    %c0_i32_0 = arith.constant 0 : i32
    %c0_i32_1 = arith.constant 0 : i32
    return %c0_i32, %c0_i32_0 : i32, i32
  }
  func.func @transform_2(%arg0: i32) -> (i32, i32) {
    %c0_i32 = arith.constant 0 : i32
    %c0_i32_0 = arith.constant 0 : i32
    %c0_i32_1 = arith.constant 0 : i32
    return %c0_i32, %c0_i32_0 : i32, i32
  }
  func.func @transform_3(%arg0: i32) -> (i32, i32) {
    %c0_i32 = arith.constant 0 : i32
    %c0_i32_0 = arith.constant 0 : i32
    %c0_i32_1 = arith.constant 0 : i32
    return %c0_i32, %c0_i32_0 : i32, i32
  }
  func.func @transform_4(%arg0: i32) -> (i32, i32) {
    %c0_i32 = arith.constant 0 : i32
    %c0_i32_0 = arith.constant 0 : i32
    %c0_i32_1 = arith.constant 0 : i32
    return %c0_i32, %c0_i32_0 : i32, i32
  }
  func.func @transform_5(%arg0: i32) -> (i32, i32) {
    %c0_i32 = arith.constant 0 : i32
    %c0_i32_0 = arith.constant 0 : i32
    %c0_i32_1 = arith.constant 0 : i32
    return %c0_i32, %c0_i32_0 : i32, i32
  }
  func.func @transform_6(%arg0: i32) -> (i32, i32) {
    %c0_i32 = arith.constant 0 : i32
    %c0_i32_0 = arith.constant 0 : i32
    %c0_i32_1 = arith.constant 0 : i32
    return %c0_i32, %c0_i32_0 : i32, i32
  }
  func.func @transform_7(%arg0: i32) -> (i32, i32) {
    %c0_i32 = arith.constant 0 : i32
    %c0_i32_0 = arith.constant 0 : i32
    return %c0_i32, %arg0 : i32, i32
  }
}

</mosaic_0001>

<bundles_post_ra>
// kernel: rain_prediction_forward.1
= control target key start
LH: loop header
LB: loop body
LE: loop exit
PB: predicated region body
PF: predicated region fallthrough
CT: control target
= control target key end

     0   :  { %vm50_vm0 = vcmask 1042432   ;;  %vm43_vm1 = vcmask 23552   ;;  %v163_v3 = vmov 0   ;;  %vm86_vm2 = vcmask 130048   ;;  %s234_s0 = inlined_call_operand.vmem [shape: f32[3,128], index: 0, kind: input, shape index: {}]   ;;  %s235_s1 = inlined_call_operand.vmem [shape: f32[16,3], index: 1, kind: input, shape index: {}]   ;;  %s236_s2 = inlined_call_operand.vmem [shape: f32[16,1], index: 2, kind: input, shape index: {}]   ;;  %s237_s4 = inlined_call_operand.vmem [shape: f32[8,1], index: 4, kind: input, shape index: {}]   ;;  %s238_s6 = inlined_call_operand.<no memory space> [shape: f32[1,1], index: 6, kind: input, shape index: {}]   ;;  %s239_s3 = inlined_call_operand.vmem [shape: f32[8,16], index: 3, kind: input, shape index: {}]   ;;  %s240_s5 = inlined_call_operand.vmem [shape: f32[1,8], index: 5, kind: input, shape index: {}]   ;;  %s241_s7 = inlined_call_operand.vmem [shape: f32[1,128], index: 7, kind: output, shape index: {}]  }
   0x1   :  { %v28_v0 = vld [vmem:[%s234_s0] sm:$0x7]  ;;  %v30_v2 = vld [vmem:[%s235_s1 + $0x8] sm:$0xff]  ;;  %159 = vset.pattern.permute.xlu0 %v163_v3  ;;  %160 = vset.pattern.permute.xlu1 %v163_v3  ;;  %v12_v7 = vstv %s238_s6  ;;  %vm119_vm3 = vcmask 64512  }
   0x2   :  { %v29_v1 = vld [vmem:[%s235_s1] sm:$0xff]  ;;  %152 = vmatpush.msk.msra.mxu0 %vm50_vm0, %v28_v0  ;;  %157 = vmatpush.msk.msra.mxu3 %vm50_vm0, %v28_v0  ;;  %v32_v4 = vld [vmem:[%s236_s2 + $0x8] sm:$0xff]  ;;  %13 = vst [vmem:[#allocation2] sm:$0x1] %v12_v7 }
   0x3   :  { %153 = vmatmul.msk.f32.vlgmr.msra.gmra.mxu0 %vm43_vm1, %v29_v1  ;;  %154 = vmatmul.msk.f32.vlgmr.msra.gmra.mxu3 %vm43_vm1, %v30_v2  ;;  %v31_v5 = vld [vmem:[%s236_s2] sm:$0xff] }
   0x4   :  { %40 = vperm.xlu0 %159, %v32_v4   ;;  %v80_v6 = vld [vmem:[%s237_s4] sm:$0xff] }
   0x5   :  { %83 = vperm.xlu1 %160, %v80_v6   ;;  %v79_v17 = vld [vmem:[%s239_s3] sm:$0xff] }
   0x6   :  { %v111_v22 = vld [vmem:[%s240_s5] sm:$0x1] }
   0x9   :  { %v112_v8 = vld [vmem:[#allocation2] sm:$0x1] }
   0xc   :  { %35 = vperm.xlu0 %159, %v31_v5  }
   0xd   :  { %115 = vperm.xlu1 %160, %v112_v8  }
  0x76   :  { %v41_v9 = vpop.permute.xlu0 %40 }
  0x77   :  { %v84_v18 = vpop.permute.xlu1 %83 }
  0x7e   :  { %v36_v10 = vpop.permute.xlu0 %35 }
  0x7f   :  { %v116_v23 = vpop.permute.xlu1 %115 }
  0x80   :  { %v71_v11 = vpop.f32.mrf.mxu0  ;;  %v118_v24 = vperm.slane %v116_v23, 0 }
  0x81   :  { %v72_v13 = vadd.f32 %v71_v11, %v36_v10 }
  0x83   :  { %v77_v16 = vmax.f32 %v72_v13, 0.0 }
  0x86   :  { %v74_v12 = vpop.f32.mrf.mxu3 }
  0x87   :  { %v75_v14 = vadd.f32 %v74_v12, %v41_v9 }
  0x89   :  { %v78_v15 = vmax.f32 %v75_v14, 0.0 }
  0x8b   :  { %104 = vmatpush.msra.mxu1 %v78_v15 }
  0x8d   :  { %105 = vmatpush.msra.mxu1 %v77_v16 }
  0x8e   :  { %155 = vmatmul.msk.f32.vlgmr.msra.gmra.mxu1 %vm86_vm2, %v79_v17 }
 0x10b   :  { %v107_v19 = vpop.f32.mrf.mxu1 }
 0x10c   :  { %v108_v20 = vadd.f32 %v107_v19, %v84_v18 }
 0x10e   :  { %v110_v21 = vmax.f32 %v108_v20, 0.0 }
 0x110   :  { %138 = vmatpush.msra.mxu2 %v110_v21 }
 0x111   :  { %156 = vmatmul.msk.f32.vlgmr.msra.gmra.mxu2 %vm119_vm3, %v111_v22 }
 0x194   :  { %v140_v25 = vpop.f32.mrf.mxu2 }
 0x195   :  { %v141_v26 = vadd.f32 %v140_v25, %v118_v24 }
 0x197   :  { %v143_v27 = vmul.f32 0.5, %v141_v26 }
 0x199   :  { %161 = vtanh.f32 %v143_v27 }
 0x19f   :  { %v162_v28 = vpop.eup %161 }
 0x1a0   :  { %v145_v29 = vmul.f32 0.5, %v162_v28 }
 0x1a2   :  { %v146_v30 = vadd.f32 0.5, %v145_v29 }
 0x1a4   :  { %147 = vst [vmem:[%s241_s7] sm:$0x1] %v146_v30 }

</bundles_post_ra>
